<compile_context>
chip_gen: v6e
topology: v6e:2x2x1
jax: 0.10.0
libtpu: 0.0.40
codegen_flags: <defaults>
</compile_context>

<pallas_src>
import functools

import jax
import jax.numpy as jnp
import numpy as np
from jax.experimental import pallas as pl
from jax.experimental.pallas import tpu as pltpu


def _round_up(x, m):
    return (x + m - 1) // m * m


def _pick_row_block(R, C, Vp, Op, itemsize=2, budget_bytes=8 << 20):
    """Pick how many (batch, time) row-groups to process per grid step.

    Constraints: RB must divide R, and the activation block's lane width
    RB*C must be a multiple of 128 unless the block covers the full lane
    axis. Among the valid choices, take the largest whose (double-buffered)
    activation + output blocks stay well inside the scoped VMEM budget.
    """
    def block_bytes(rb):
        return 2 * (Vp * rb * C * itemsize + rb * Vp * Op * 4)

    divisors = [d for d in range(1, R + 1) if R % d == 0]
    ok = [d for d in divisors if d == R or (d * C) % 128 == 0]
    fits = [d for d in ok if block_bytes(d) <= budget_bytes]
    return max(fits) if fits else min(ok)


def _gcn_kernel(order, support_len, c_in, row_blk, x_ref, at_ref, wt_ref,
                shift_ref, o_ref):
    """One grid step: `row_blk` (batch, time) row-groups, all nodes.

    x_ref     : (Vp, row_blk*C)   nodes on sublanes, lanes = (row-group, chan)
    at_ref    : (S, Vp, Vp)       transposed, zero-padded supports (resident)
    wt_ref    : (P*C, O_pad)      dense conv weight, BN scale folded in
    shift_ref : (1, O_pad)        conv bias + BN shift, f32
    o_ref     : (row_blk*Vp, O_pad)
    """
    X = x_ref[...]                                         # (Vp, RB*C)

    # --- nconv chain: one wide MXU matmul per (support, hop). A^T contracts
    #     the node (sublane) axis and is linear over the (row, chan) lanes.
    pieces = [X]
    for s in range(support_len):
        at = at_ref[s]                                     # (Vp, Vp)
        cur = X
        for _ in range(order):
            cur = jnp.dot(at, cur, preferred_element_type=X.dtype)
            pieces.append(cur)

    # --- relayout lanes (r, c) -> rows (r, v), lanes (p, c) via static
    #     slices/concats, then a single dense 1x1-conv contraction (no kron).
    rows = []
    for r in range(row_blk):
        rows.append(jnp.concatenate(
            [p[:, r * c_in:(r + 1) * c_in] for p in pieces], axis=1))
    h = jnp.concatenate(rows, axis=0)                      # (RB*Vp, P*C)

    y = jnp.dot(h, wt_ref[...], preferred_element_type=jnp.float32)
    y = y + shift_ref[...]                                 # bias + BN, f32
    # TODO(synk): dropout is identity (eval mode); training-mode dropout would
    # use pltpu.prng_seed / pltpu.prng_random_bits.
    o_ref[...] = y.astype(o_ref.dtype)                     # lane-dense store


def graph_conv_net(x, supports, conv_w, conv_b, bn_gamma, bn_beta, bn_mean,
                   bn_var, *, order=2, eps=1e-5, mxu_dtype=jnp.bfloat16,
                   row_block=None):
    """x: (N, C, V, L); supports: list of (V, V); conv_w: (c_out, P*C).

    Returns (N, c_out, V, L). Eval-mode forward of GraphConvNet (conv bias and
    BatchNorm2d running stats folded into the weight / a single shift).
    # TODO(synk): the optional cross_x / add_cross branch is not implemented
    # (forward is called without cross_x).
    """
    N, C, V, L = x.shape
    S = len(supports)
    O = conv_w.shape[0]
    P = order * S + 1
    assert conv_w.shape == (O, P * C)

    Vp = _round_up(V, 8)            # node axis padded to a sublane multiple
    Op = _round_up(O, 128)          # lane-dense output / full MXU columns
    R = N * L                       # number of (batch, time) row-groups
    RB = row_block or _pick_row_block(
        R, C, Vp, Op, itemsize=jnp.dtype(mxu_dtype).itemsize)
    assert R % RB == 0 and (RB == R or (RB * C) % 128 == 0)

    # ---- layout / parameter packing (plain JAX glue) ----
    # activations: (N, C, V, L) -> (Vp, N*L*C), lanes ordered (n, l, c)
    xt = jnp.transpose(x, (2, 0, 3, 1))                    # (V, N, L, C)
    xt = jnp.pad(xt, ((0, Vp - V), (0, 0), (0, 0), (0, 0)))
    xf = xt.reshape(Vp, R * C).astype(mxu_dtype)

    # supports transposed so that nconv == A^T @ X, zero-padded to Vp
    at = jnp.stack([jnp.pad(a.T, ((0, Vp - V), (0, Vp - V))) for a in supports])
    at = at.astype(mxu_dtype)                              # (S, Vp, Vp)

    # dense conv weight with BN scale folded into output columns; pad O -> Op
    scale = bn_gamma / jnp.sqrt(bn_var + eps)              # (O,)
    wt = (conv_w * scale[:, None]).T                       # (P*C, O)
    wt = jnp.pad(wt, ((0, 0), (0, Op - O))).astype(mxu_dtype)
    shift = scale * conv_b + bn_beta - scale * bn_mean     # (O,)
    shift = jnp.pad(shift, (0, Op - O)).astype(jnp.float32)[None, :]

    kernel = functools.partial(_gcn_kernel, order, S, C, RB)
    out_flat = pl.pallas_call(
        kernel,
        out_shape=jax.ShapeDtypeStruct((R * Vp, Op), x.dtype),
        grid=(R // RB,),
        in_specs=[
            pl.BlockSpec((Vp, RB * C), lambda i: (0, i)),   # activation block
            pl.BlockSpec((S, Vp, Vp), lambda i: (0, 0, 0)),  # resident supports
            pl.BlockSpec((P * C, Op), lambda i: (0, 0)),     # resident weight
            pl.BlockSpec((1, Op), lambda i: (0, 0)),         # resident shift
        ],
        out_specs=pl.BlockSpec((RB * Vp, Op), lambda i: (i, 0)),
        compiler_params=pltpu.CompilerParams(
            dimension_semantics=("parallel",),
            vmem_limit_bytes=32 * 1024 * 1024),
    )(xf, at, wt, shift)

    # (R*Vp, Op) rows ordered (n, l, v) -> (N, O, V, L); drop padding
    out = out_flat.reshape(N, L, Vp, Op)[:, :, :V, :O]
    return jnp.transpose(out, (0, 3, 2, 1))


def ref_forward(x, supports, conv_w, conv_b, bn_gamma, bn_beta, bn_mean, bn_var,
                order=2, eps=1e-5):
    """Pure-JAX reference mirroring the PyTorch module (eval mode)."""
    out = [x]
    for A in supports:
        x1 = jnp.einsum('ncvl,vw->ncwl', x, A)
        out.append(x1)
        for _ in range(2, order + 1):
            x2 = jnp.einsum('ncvl,vw->ncwl', x1, A)
            out.append(x2)
            x1 = x2
    h = jnp.concatenate(out, axis=1)
    h = jnp.einsum('oc,ncvl->novl', conv_w, h) + conv_b[None, :, None, None]
    scale = bn_gamma / jnp.sqrt(bn_var + eps)
    h = (scale[None, :, None, None] * (h - bn_mean[None, :, None, None])
         + bn_beta[None, :, None, None])
    return h


if __name__ == "__main__":
    key = jax.random.PRNGKey(0)
    N, C, V, L = 2, 4, 16, 8      # batch, in-channels, nodes, time
    O = 8                         # out-channels
    order, support_len = 2, 1
    P = order * support_len + 1

    ks = jax.random.split(key, 4)
    x = jax.random.normal(ks[0], (N, C, V, L), dtype=jnp.float32)
    A_raw = jax.random.uniform(ks[1], (V, V), dtype=jnp.float32)
    A = A_raw / jnp.sum(A_raw, axis=1, keepdims=True)        # row-normalized
    supports = [A]

    conv_w = 0.1 * jax.random.normal(ks[2], (O, P * C), dtype=jnp.float32)
    conv_b = 0.1 * jax.random.normal(ks[3], (O,), dtype=jnp.float32)
    # BatchNorm2d defaults of a freshly constructed module (eval mode)
    bn_gamma = jnp.ones((O,), jnp.float32)
    bn_beta = jnp.zeros((O,), jnp.float32)
    bn_mean = jnp.zeros((O,), jnp.float32)
    bn_var = jnp.ones((O,), jnp.float32)

    ref = ref_forward(x, supports, conv_w, conv_b, bn_gamma, bn_beta,
                      bn_mean, bn_var, order=order)

    # f32 MXU path: tight check against the reference.
    out_f32 = graph_conv_net(x, supports, conv_w, conv_b, bn_gamma, bn_beta,
                             bn_mean, bn_var, order=order,
                             mxu_dtype=jnp.float32)
    out_f32 = jax.block_until_ready(out_f32)
    assert out_f32.shape == (N, O, V, L)
    np.testing.assert_allclose(np.asarray(out_f32), np.asarray(ref),
                               rtol=1e-4, atol=1e-4)

    # bf16 MXU operands with f32 accumulation (v6e/v7x fast path): loose tol.
    out_bf16 = graph_conv_net(x, supports, conv_w, conv_b, bn_gamma, bn_beta,
                              bn_mean, bn_var, order=order,
                              mxu_dtype=jnp.bfloat16)
    out_bf16 = jax.block_until_ready(out_bf16)
    assert out_bf16.shape == (N, O, V, L)
    np.testing.assert_allclose(np.asarray(out_bf16), np.asarray(ref),
                               rtol=2e-2, atol=2e-2)

    print("KERNEL_OK")
</pallas_src>

<mosaic_0001>
module attributes {stable_mosaic.version = 11 : i64} {
  func.func @_gcn_kernel(%arg0: i32, %arg1: memref<16x64xf32, #tpu.memory_space<vmem>>, %arg2: memref<1x16x16xf32, #tpu.memory_space<vmem>>, %arg3: memref<12x128xf32, #tpu.memory_space<vmem>>, %arg4: memref<1x128xf32, #tpu.memory_space<vmem>>, %arg5: memref<256x128xf32, #tpu.memory_space<vmem>>) attributes {dimension_semantics = [#tpu.dimension_semantics<parallel>], iteration_bounds = array<i64: 1>, scalar_prefetch = 0 : i64, scratch_operands = 0 : i64, tpu.core_type = #tpu.core_type<tc>, window_params = [{transform_indices = @transform_0, window_bounds = array<i64: 16, 64>}, {pipeline_mode = #tpu.pipeline_mode<synchronous>, transform_indices = @transform_1, window_bounds = array<i64: 1, 16, 16>}, {pipeline_mode = #tpu.pipeline_mode<synchronous>, transform_indices = @transform_2, window_bounds = array<i64: 12, 128>}, {pipeline_mode = #tpu.pipeline_mode<synchronous>, transform_indices = @transform_3, window_bounds = array<i64: 1, 128>}, {transform_indices = @transform_4, window_bounds = array<i64: 256, 128>}]} {
    %c0 = arith.constant 0 : index
    %c0_0 = arith.constant 0 : index
    %0 = vector.load %arg1[%c0, %c0_0] : memref<16x64xf32, #tpu.memory_space<vmem>>, vector<16x64xf32>
    %c0_1 = arith.constant 0 : index
    %c0_2 = arith.constant 0 : index
    %c0_3 = arith.constant 0 : index
    %1 = vector.load %arg2[%c0_1, %c0_2, %c0_3] : memref<1x16x16xf32, #tpu.memory_space<vmem>>, vector<1x16x16xf32>
    %2 = vector.shape_cast %1 : vector<1x16x16xf32> to vector<16x16xf32>
    %cst = arith.constant dense<0.000000e+00> : vector<16x64xf32>
    %3 = tpu.matmul %2, %0, %cst {dimension_numbers = #tpu.dot_dimension_numbers<[1], [0], [0], [1], [0, 0, 1, 1], [], []>} : vector<16x16xf32>, vector<16x64xf32>, vector<16x64xf32> -> vector<16x64xf32>
    %cst_4 = arith.constant dense<0.000000e+00> : vector<16x64xf32>
    %4 = tpu.matmul %2, %3, %cst_4 {dimension_numbers = #tpu.dot_dimension_numbers<[1], [0], [0], [1], [0, 0, 1, 1], [], []>} : vector<16x16xf32>, vector<16x64xf32>, vector<16x64xf32> -> vector<16x64xf32>
    %5 = vector.extract_strided_slice %0 {offsets = [0, 0], sizes = [16, 4], strides = [1, 1]} : vector<16x64xf32> to vector<16x4xf32>
    %6 = vector.extract_strided_slice %3 {offsets = [0, 0], sizes = [16, 4], strides = [1, 1]} : vector<16x64xf32> to vector<16x4xf32>
    %7 = vector.extract_strided_slice %4 {offsets = [0, 0], sizes = [16, 4], strides = [1, 1]} : vector<16x64xf32> to vector<16x4xf32>
    %8 = tpu.concatenate %5, %6, %7 in 1 : vector<16x4xf32>, vector<16x4xf32>, vector<16x4xf32> -> vector<16x12xf32>
    %9 = vector.extract_strided_slice %0 {offsets = [0, 4], sizes = [16, 4], strides = [1, 1]} : vector<16x64xf32> to vector<16x4xf32>
    %10 = vector.extract_strided_slice %3 {offsets = [0, 4], sizes = [16, 4], strides = [1, 1]} : vector<16x64xf32> to vector<16x4xf32>
    %11 = vector.extract_strided_slice %4 {offsets = [0, 4], sizes = [16, 4], strides = [1, 1]} : vector<16x64xf32> to vector<16x4xf32>
    %12 = tpu.concatenate %9, %10, %11 in 1 : vector<16x4xf32>, vector<16x4xf32>, vector<16x4xf32> -> vector<16x12xf32>
    %13 = vector.extract_strided_slice %0 {offsets = [0, 8], sizes = [16, 4], strides = [1, 1]} : vector<16x64xf32> to vector<16x4xf32>
    %14 = vector.extract_strided_slice %3 {offsets = [0, 8], sizes = [16, 4], strides = [1, 1]} : vector<16x64xf32> to vector<16x4xf32>
    %15 = vector.extract_strided_slice %4 {offsets = [0, 8], sizes = [16, 4], strides = [1, 1]} : vector<16x64xf32> to vector<16x4xf32>
    %16 = tpu.concatenate %13, %14, %15 in 1 : vector<16x4xf32>, vector<16x4xf32>, vector<16x4xf32> -> vector<16x12xf32>
    %17 = vector.extract_strided_slice %0 {offsets = [0, 12], sizes = [16, 4], strides = [1, 1]} : vector<16x64xf32> to vector<16x4xf32>
    %18 = vector.extract_strided_slice %3 {offsets = [0, 12], sizes = [16, 4], strides = [1, 1]} : vector<16x64xf32> to vector<16x4xf32>
    %19 = vector.extract_strided_slice %4 {offsets = [0, 12], sizes = [16, 4], strides = [1, 1]} : vector<16x64xf32> to vector<16x4xf32>
    %20 = tpu.concatenate %17, %18, %19 in 1 : vector<16x4xf32>, vector<16x4xf32>, vector<16x4xf32> -> vector<16x12xf32>
    %21 = vector.extract_strided_slice %0 {offsets = [0, 16], sizes = [16, 4], strides = [1, 1]} : vector<16x64xf32> to vector<16x4xf32>
    %22 = vector.extract_strided_slice %3 {offsets = [0, 16], sizes = [16, 4], strides = [1, 1]} : vector<16x64xf32> to vector<16x4xf32>
    %23 = vector.extract_strided_slice %4 {offsets = [0, 16], sizes = [16, 4], strides = [1, 1]} : vector<16x64xf32> to vector<16x4xf32>
    %24 = tpu.concatenate %21, %22, %23 in 1 : vector<16x4xf32>, vector<16x4xf32>, vector<16x4xf32> -> vector<16x12xf32>
    %25 = vector.extract_strided_slice %0 {offsets = [0, 20], sizes = [16, 4], strides = [1, 1]} : vector<16x64xf32> to vector<16x4xf32>
    %26 = vector.extract_strided_slice %3 {offsets = [0, 20], sizes = [16, 4], strides = [1, 1]} : vector<16x64xf32> to vector<16x4xf32>
    %27 = vector.extract_strided_slice %4 {offsets = [0, 20], sizes = [16, 4], strides = [1, 1]} : vector<16x64xf32> to vector<16x4xf32>
    %28 = tpu.concatenate %25, %26, %27 in 1 : vector<16x4xf32>, vector<16x4xf32>, vector<16x4xf32> -> vector<16x12xf32>
    %29 = vector.extract_strided_slice %0 {offsets = [0, 24], sizes = [16, 4], strides = [1, 1]} : vector<16x64xf32> to vector<16x4xf32>
    %30 = vector.extract_strided_slice %3 {offsets = [0, 24], sizes = [16, 4], strides = [1, 1]} : vector<16x64xf32> to vector<16x4xf32>
    %31 = vector.extract_strided_slice %4 {offsets = [0, 24], sizes = [16, 4], strides = [1, 1]} : vector<16x64xf32> to vector<16x4xf32>
    %32 = tpu.concatenate %29, %30, %31 in 1 : vector<16x4xf32>, vector<16x4xf32>, vector<16x4xf32> -> vector<16x12xf32>
    %33 = vector.extract_strided_slice %0 {offsets = [0, 28], sizes = [16, 4], strides = [1, 1]} : vector<16x64xf32> to vector<16x4xf32>
    %34 = vector.extract_strided_slice %3 {offsets = [0, 28], sizes = [16, 4], strides = [1, 1]} : vector<16x64xf32> to vector<16x4xf32>
    %35 = vector.extract_strided_slice %4 {offsets = [0, 28], sizes = [16, 4], strides = [1, 1]} : vector<16x64xf32> to vector<16x4xf32>
    %36 = tpu.concatenate %33, %34, %35 in 1 : vector<16x4xf32>, vector<16x4xf32>, vector<16x4xf32> -> vector<16x12xf32>
    %37 = vector.extract_strided_slice %0 {offsets = [0, 32], sizes = [16, 4], strides = [1, 1]} : vector<16x64xf32> to vector<16x4xf32>
    %38 = vector.extract_strided_slice %3 {offsets = [0, 32], sizes = [16, 4], strides = [1, 1]} : vector<16x64xf32> to vector<16x4xf32>
    %39 = vector.extract_strided_slice %4 {offsets = [0, 32], sizes = [16, 4], strides = [1, 1]} : vector<16x64xf32> to vector<16x4xf32>
    %40 = tpu.concatenate %37, %38, %39 in 1 : vector<16x4xf32>, vector<16x4xf32>, vector<16x4xf32> -> vector<16x12xf32>
    %41 = vector.extract_strided_slice %0 {offsets = [0, 36], sizes = [16, 4], strides = [1, 1]} : vector<16x64xf32> to vector<16x4xf32>
    %42 = vector.extract_strided_slice %3 {offsets = [0, 36], sizes = [16, 4], strides = [1, 1]} : vector<16x64xf32> to vector<16x4xf32>
    %43 = vector.extract_strided_slice %4 {offsets = [0, 36], sizes = [16, 4], strides = [1, 1]} : vector<16x64xf32> to vector<16x4xf32>
    %44 = tpu.concatenate %41, %42, %43 in 1 : vector<16x4xf32>, vector<16x4xf32>, vector<16x4xf32> -> vector<16x12xf32>
    %45 = vector.extract_strided_slice %0 {offsets = [0, 40], sizes = [16, 4], strides = [1, 1]} : vector<16x64xf32> to vector<16x4xf32>
    %46 = vector.extract_strided_slice %3 {offsets = [0, 40], sizes = [16, 4], strides = [1, 1]} : vector<16x64xf32> to vector<16x4xf32>
    %47 = vector.extract_strided_slice %4 {offsets = [0, 40], sizes = [16, 4], strides = [1, 1]} : vector<16x64xf32> to vector<16x4xf32>
    %48 = tpu.concatenate %45, %46, %47 in 1 : vector<16x4xf32>, vector<16x4xf32>, vector<16x4xf32> -> vector<16x12xf32>
    %49 = vector.extract_strided_slice %0 {offsets = [0, 44], sizes = [16, 4], strides = [1, 1]} : vector<16x64xf32> to vector<16x4xf32>
    %50 = vector.extract_strided_slice %3 {offsets = [0, 44], sizes = [16, 4], strides = [1, 1]} : vector<16x64xf32> to vector<16x4xf32>
    %51 = vector.extract_strided_slice %4 {offsets = [0, 44], sizes = [16, 4], strides = [1, 1]} : vector<16x64xf32> to vector<16x4xf32>
    %52 = tpu.concatenate %49, %50, %51 in 1 : vector<16x4xf32>, vector<16x4xf32>, vector<16x4xf32> -> vector<16x12xf32>
    %53 = vector.extract_strided_slice %0 {offsets = [0, 48], sizes = [16, 4], strides = [1, 1]} : vector<16x64xf32> to vector<16x4xf32>
    %54 = vector.extract_strided_slice %3 {offsets = [0, 48], sizes = [16, 4], strides = [1, 1]} : vector<16x64xf32> to vector<16x4xf32>
    %55 = vector.extract_strided_slice %4 {offsets = [0, 48], sizes = [16, 4], strides = [1, 1]} : vector<16x64xf32> to vector<16x4xf32>
    %56 = tpu.concatenate %53, %54, %55 in 1 : vector<16x4xf32>, vector<16x4xf32>, vector<16x4xf32> -> vector<16x12xf32>
    %57 = vector.extract_strided_slice %0 {offsets = [0, 52], sizes = [16, 4], strides = [1, 1]} : vector<16x64xf32> to vector<16x4xf32>
    %58 = vector.extract_strided_slice %3 {offsets = [0, 52], sizes = [16, 4], strides = [1, 1]} : vector<16x64xf32> to vector<16x4xf32>
    %59 = vector.extract_strided_slice %4 {offsets = [0, 52], sizes = [16, 4], strides = [1, 1]} : vector<16x64xf32> to vector<16x4xf32>
    %60 = tpu.concatenate %57, %58, %59 in 1 : vector<16x4xf32>, vector<16x4xf32>, vector<16x4xf32> -> vector<16x12xf32>
    %61 = vector.extract_strided_slice %0 {offsets = [0, 56], sizes = [16, 4], strides = [1, 1]} : vector<16x64xf32> to vector<16x4xf32>
    %62 = vector.extract_strided_slice %3 {offsets = [0, 56], sizes = [16, 4], strides = [1, 1]} : vector<16x64xf32> to vector<16x4xf32>
    %63 = vector.extract_strided_slice %4 {offsets = [0, 56], sizes = [16, 4], strides = [1, 1]} : vector<16x64xf32> to vector<16x4xf32>
    %64 = tpu.concatenate %61, %62, %63 in 1 : vector<16x4xf32>, vector<16x4xf32>, vector<16x4xf32> -> vector<16x12xf32>
    %65 = vector.extract_strided_slice %0 {offsets = [0, 60], sizes = [16, 4], strides = [1, 1]} : vector<16x64xf32> to vector<16x4xf32>
    %66 = vector.extract_strided_slice %3 {offsets = [0, 60], sizes = [16, 4], strides = [1, 1]} : vector<16x64xf32> to vector<16x4xf32>
    %67 = vector.extract_strided_slice %4 {offsets = [0, 60], sizes = [16, 4], strides = [1, 1]} : vector<16x64xf32> to vector<16x4xf32>
    %68 = tpu.concatenate %65, %66, %67 in 1 : vector<16x4xf32>, vector<16x4xf32>, vector<16x4xf32> -> vector<16x12xf32>
    %69 = tpu.concatenate %8, %12, %16, %20, %24, %28, %32, %36, %40, %44, %48, %52, %56, %60, %64, %68 in 0 : vector<16x12xf32>, vector<16x12xf32>, vector<16x12xf32>, vector<16x12xf32>, vector<16x12xf32>, vector<16x12xf32>, vector<16x12xf32>, vector<16x12xf32>, vector<16x12xf32>, vector<16x12xf32>, vector<16x12xf32>, vector<16x12xf32>, vector<16x12xf32>, vector<16x12xf32>, vector<16x12xf32>, vector<16x12xf32> -> vector<256x12xf32>
    %c0_5 = arith.constant 0 : index
    %c0_6 = arith.constant 0 : index
    %70 = vector.load %arg3[%c0_5, %c0_6] : memref<12x128xf32, #tpu.memory_space<vmem>>, vector<12x128xf32>
    %cst_7 = arith.constant dense<0.000000e+00> : vector<256x128xf32>
    %71 = tpu.matmul %69, %70, %cst_7 {dimension_numbers = #tpu.dot_dimension_numbers<[1], [0], [0], [1], [0, 0, 1, 1], [], []>} : vector<256x12xf32>, vector<12x128xf32>, vector<256x128xf32> -> vector<256x128xf32>
    %c0_8 = arith.constant 0 : index
    %c0_9 = arith.constant 0 : index
    %72 = vector.load %arg4[%c0_8, %c0_9] : memref<1x128xf32, #tpu.memory_space<vmem>>, vector<1x128xf32>
    %73 = vector.broadcast %72 : vector<1x128xf32> to vector<256x128xf32>
    %74 = arith.addf %71, %73 : vector<256x128xf32>
    %c0_10 = arith.constant 0 : index
    %c0_11 = arith.constant 0 : index
    %75 = vector.load %arg5[%c0_10, %c0_11] : memref<256x128xf32, #tpu.memory_space<vmem>>, vector<256x128xf32>
    tpu.vector_store %arg5[%c0_10, %c0_11], %74 {strides = array<i32>} : memref<256x128xf32, #tpu.memory_space<vmem>>, vector<256x128xf32>,
    return
  }
  func.func @transform_0(%arg0: i32) -> (i32, i32) {
    %c0_i32 = arith.constant 0 : i32
    %c0_i32_0 = arith.constant 0 : i32
    return %c0_i32, %arg0 : i32, i32
  }
  func.func @transform_1(%arg0: i32) -> (i32, i32, i32) {
    %c0_i32 = arith.constant 0 : i32
    %c0_i32_0 = arith.constant 0 : i32
    %c0_i32_1 = arith.constant 0 : i32
    %c0_i32_2 = arith.constant 0 : i32
    return %c0_i32, %c0_i32_0, %c0_i32_1 : i32, i32, i32
  }
  func.func @transform_2(%arg0: i32) -> (i32, i32) {
    %c0_i32 = arith.constant 0 : i32
    %c0_i32_0 = arith.constant 0 : i32
    %c0_i32_1 = arith.constant 0 : i32
    return %c0_i32, %c0_i32_0 : i32, i32
  }
  func.func @transform_3(%arg0: i32) -> (i32, i32) {
    %c0_i32 = arith.constant 0 : i32
    %c0_i32_0 = arith.constant 0 : i32
    %c0_i32_1 = arith.constant 0 : i32
    return %c0_i32, %c0_i32_0 : i32, i32
  }
  func.func @transform_4(%arg0: i32) -> (i32, i32) {
    %c0_i32 = arith.constant 0 : i32
    %c0_i32_0 = arith.constant 0 : i32
    return %arg0, %c0_i32 : i32, i32
  }
}

</mosaic_0001>

<bundles_post_ra>
// kernel: tpu_custom_call.1
= control target key start
LH: loop header
LB: loop body
LE: loop exit
PB: predicated region body
PF: predicated region fallthrough
CT: control target
= control target key end

     0   :  { %9 = vsyncpa [#allocation3], 0  ;;  %s1785_s0 = inlined_call_operand.hbm [shape: f32[16,64], index: 0, kind: input, shape index: {}]   ;;  %s1786_s1 = inlined_call_operand.hbm [shape: f32[1,16,16], index: 1, kind: input, shape index: {}]   ;;  %s1787_s2 = inlined_call_operand.hbm [shape: f32[12,128], index: 2, kind: input, shape index: {}]   ;;  %s1788_s3 = inlined_call_operand.vmem [shape: f32[1,128], index: 3, kind: input, shape index: {}]   ;;  %s1789_s4 = inlined_call_operand.hbm [shape: f32[256,128], index: 4, kind: output, shape index: {}]  }
   0x1   :  { %10 = vsyncpa [#allocation6], 0 }
   0x2   :  { %11 = vsyncpa [#allocation4], 0  ;;  %s1205_s15 = smov [#allocation5]   ;;  %s1206_s17 = smov [#allocation2]  }
   0x3   :  { %s29_s16 = sshll.u32 %s1205_s15, 4  ;;  %s17_s18 = sshll.u32 %s1206_s17, 4  ;;  %s30_s16 = int_to_ptr.vmem [resolvable:$true] %s29_s16  ;;  %s18_s18 = int_to_ptr.vmem [resolvable:$true] %s17_s18 }
   0x4   :  { %s1127_s19 = scalar_lea.vmem %s30_s16, 256  ;;  %p1132_p1 = scmp.lt.s32.totalorder %s30_s16, %s30_s16 }
   0x5   :  { %p1128_p0 = scmp.ne.s32.totalorder %s30_s16, %s1127_s19  ;;  %p1133_p2 = scmp.lt.s32.totalorder %s1127_s19, %s1127_s19 }
   0x7   :  { %p1134_p3 = por %p1133_p2, %p1132_p1 }
   0x9   :  { %p1135_p4 = pnand %p1134_p3, %p1128_p0 }
   0xb   :  { %1138 = shalt.err (!%p1135_p4)
}
   0xc   :  { %s1207_s20 = smov 128   ;;  %s1208_s21 = smov 8  }
   0xd   :  { %35 = dma.hbm_to_vmem [thread:$0]  %s1786_s1, 256, %s30_s16, [#allocation6], %s1207_s20, %s1207_s20, %s1208_s21  }
   0xe   :  { %s1147_s24 = scalar_lea.vmem %s18_s18, 256  ;;  %p1152_p6 = scmp.lt.s32.totalorder %s18_s18, %s18_s18 }
   0xf   :  { %p1148_p5 = scmp.ne.s32.totalorder %s18_s18, %s1147_s24  ;;  %p1153_p7 = scmp.lt.s32.totalorder %s1147_s24, %s1147_s24 }
  0x11   :  { %p1154_p8 = por %p1153_p7, %p1152_p6 }
  0x13   :  { %p1155_p9 = pnand %p1154_p8, %p1148_p5 }
  0x15   :  { %1158 = shalt.err (!%p1155_p9)
}
  0x16   :  { %23 = dma.hbm_to_vmem [thread:$0]  %s1785_s0, 256, %s18_s18, [#allocation3], %s1207_s20, %s1207_s20, %s1208_s21  }
  0x17   :  { %s1209_s27 = smov [#allocation7]  }
  0x18   :  { %s41_s28 = sshll.u32 %s1209_s27, 4  ;;  %s42_s28 = int_to_ptr.vmem [resolvable:$true] %s41_s28 }
  0x19   :  { %s1167_s29 = scalar_lea.vmem %s42_s28, 256  ;;  %p1172_p11 = scmp.lt.s32.totalorder %s42_s28, %s42_s28 }
  0x1a   :  { %p1168_p10 = scmp.ne.s32.totalorder %s42_s28, %s1167_s29  ;;  %p1173_p12 = scmp.lt.s32.totalorder %s1167_s29, %s1167_s29 }
  0x1c   :  { %p1174_p13 = por %p1173_p12, %p1172_p11 }
  0x1e   :  { %p1175_p0 = pnand %p1174_p13, %p1168_p10 }
  0x20   :  { %1178 = shalt.err (!%p1175_p0)
}
  0x21   :  { %47 = dma.hbm_to_vmem [thread:$0]  %s1787_s2, 256, %s42_s28, [#allocation6], %s1207_s20, %s1207_s20, %s1208_s21  }
  0x22   :  { %1199 = dma.done.wait [#allocation3], 256  }
  0x23   :  { %1200 = vsyncadd [#allocation3], 4294967040 }
  0x24   :  { %1201 = dma.done.wait [#allocation6], 512  }
  0x25   :  { %1202 = vsyncadd [#allocation6], 4294966784  ;;  %vm63_vm0 = vcmask 130048   ;;  %v1270_v0 = vld [vmem:[#allocation2 + $0x8] sm:$0xff]  ;;  %v1272_v1 = vld [vmem:[#allocation2] sm:$0xff]  ;;  %s1210_s0 = smov 96  }
  0x26   :  { %v61_v2 = vld [vmem:[#allocation5] sm:$0xff]  ;;  %1027 = vmatprep.subr.mxu0 %v1270_v0  ;;  %v1277_v3 = vld [vmem:[#allocation5 + $0x8] sm:$0xff]  ;;  %388 = vrot.lane.b32.xlu1 %v1270_v0, %s1210_s0  ;;  %s1211_s2 = smov 92   ;;  %s1212_s5 = smov 124   ;;  %vm236_vm1 = vcmask 31744   ;;  %vm239_vm2 = vcmask 64512  }
  0x27   :  { %1031 = vmatprep.mubr.msk.f32.mxu0 %vm63_vm0, %v61_v2  ;;  %1028 = vmatpush3.msra.mxu0 %v1270_v0  ;;  %s1213_s6 = smov 120   ;;  %s1214_s7 = smov 88   ;;  %v563_v54 = vld [vmem:[#allocation7 + $0x8] sm:$0xf]  ;;  %vm668_vm3 = vcmask 1043456   ;;  %v562_v55 = vld [vmem:[#allocation7] sm:$0xff] }
  0x28   :  { %1029 = vmatprep.subr.mxu0 %v1272_v1  ;;  %386 = vrot.lane.b32.xlu0 %v1272_v1, %s1210_s0  ;;  %s1215_s8 = smov 84   ;;  %s1216_s9 = smov 80   ;;  %vm571_vm4 = vcmask 97280  }
  0x29   :  { %1030 = vmatpush3.msra.mxu0 %v1272_v1  ;;  %1038 = vmatprep.mubr.msk.f32.mxu1 %vm63_vm0, %v61_v2  ;;  %s1217_s10 = smov 76   ;;  %s1218_s11 = smov 116  }
  0x2a   :  { %1032 = vmatmul.mubr.msk.f32.vlgmr.msra.gmra.mxu0 %vm63_vm0, %v1277_v3  ;;  %408 = vrot.lane.b32.xlu1 %v1272_v1, %s1211_s2  ;;  %s1219_s12 = smov 72   ;;  %s1220_s13 = smov 112  }
  0x2b   :  { %s1221_s14 = smov 108   ;;  %s1222_s15 = smov 104   ;;  %1041 = vmatprep.subr.msk.mxu0 %vm668_vm3, %v563_v54 }
  0x2c   :  { %244 = vrot.lane.b32.xlu0 %v1272_v1, %s1212_s5  ;;  %s1223_s16 = smov 100   ;;  %s1224_s17 = smov 68   ;;  %1042 = vmatpush3.msk.msra.mxu0 %vm668_vm3, %v563_v54 }
  0x2d   :  { %s1225_s18 = smov 4   ;;  %1043 = vmatprep.subr.mxu0 %v562_v55 }
  0x2e   :  { %246 = vrot.lane.b32.xlu1 %v1270_v0, %s1212_s5  ;;  %1044 = vmatpush3.msra.mxu0 %v562_v55 }
  0x30   :  { %260 = vrot.lane.b32.xlu0 %v1272_v1, %s1213_s6 }
  0x32   :  { %410 = vrot.lane.b32.xlu1 %v1270_v0, %s1211_s2 }
  0x34   :  { %430 = vrot.lane.b32.xlu0 %v1272_v1, %s1214_s7 }
  0x36   :  { %454 = vrot.lane.b32.xlu1 %v1270_v0, %s1215_s8 }
  0x38   :  { %262 = vrot.lane.b32.xlu0 %v1270_v0, %s1213_s6 }
  0x3a   :  { %476 = vrot.lane.b32.xlu1 %v1270_v0, %s1216_s9 }
  0x3c   :  { %432 = vrot.lane.b32.xlu0 %v1270_v0, %s1214_s7 }
  0x3e   :  { %498 = vrot.lane.b32.xlu1 %v1270_v0, %s1217_s10 }
  0x40   :  { %276 = vrot.lane.b32.xlu0 %v1272_v1, %s1218_s11 }
  0x42   :  { %520 = vrot.lane.b32.xlu1 %v1270_v0, %s1219_s12 }
  0x44   :  { %452 = vrot.lane.b32.xlu0 %v1272_v1, %s1215_s8 }
  0x48   :  { %278 = vrot.lane.b32.xlu0 %v1270_v0, %s1218_s11 }
  0x4c   :  { %298 = vrot.lane.b32.xlu0 %v1272_v1, %s1220_s13 }
  0x50   :  { %474 = vrot.lane.b32.xlu0 %v1272_v1, %s1216_s9 }
  0x54   :  { %300 = vrot.lane.b32.xlu0 %v1270_v0, %s1220_s13 }
  0x58   :  { %320 = vrot.lane.b32.xlu0 %v1272_v1, %s1221_s14 }
  0x5c   :  { %496 = vrot.lane.b32.xlu0 %v1272_v1, %s1217_s10 }
  0x60   :  { %322 = vrot.lane.b32.xlu0 %v1270_v0, %s1221_s14 }
  0x64   :  { %342 = vrot.lane.b32.xlu0 %v1272_v1, %s1222_s15 }
  0x68   :  { %518 = vrot.lane.b32.xlu0 %v1272_v1, %s1219_s12 }
  0x6c   :  { %344 = vrot.lane.b32.xlu0 %v1270_v0, %s1222_s15 }
  0x70   :  { %364 = vrot.lane.b32.xlu0 %v1272_v1, %s1223_s16 }
  0x74   :  { %540 = vrot.lane.b32.xlu0 %v1272_v1, %s1224_s17 }
  0x78   :  { %366 = vrot.lane.b32.xlu0 %v1270_v0, %s1223_s16 }
  0x98   :  { %v1430_v20 = vpop.permute.xlu1 %388 }
  0x9a   :  { %v1342_v4 = vpop.permute.xlu0 %386 }
  0x9c   :  { %v1438_v22 = vpop.permute.xlu1 %408 }
  0x9e   :  { %v1344_v5 = vpop.permute.xlu0 %244 }
  0xa0   :  { %v1444_v24 = vpop.permute.xlu1 %246 }
  0xa2   :  { %v1352_v7 = vpop.permute.xlu0 %260 }
  0xa4   :  { %v1448_v25 = vpop.permute.xlu1 %410 }
  0xa6   :  { %v1366_v9 = vpop.permute.xlu0 %430 }
  0xa8   :  { %v1452_v27 = vpop.permute.xlu1 %454 }
  0xaa   :  { %v1374_v10 = vpop.permute.xlu0 %262 }
  0xac   :  { %v1456_v29 = vpop.permute.xlu1 %476 }
  0xae   :  { %v1382_v11 = vpop.permute.xlu0 %432 }
  0xb0   :  { %v1460_v31 = vpop.permute.xlu1 %498 }
  0xb2   :  { %v1390_v12 = vpop.permute.xlu0 %276 }
  0xb4   :  { %v521_v33 = vpop.permute.xlu1 %520 }
  0xb6   :  { %v1398_v13 = vpop.permute.xlu0 %452 }
  0xba   :  { %v1402_v14 = vpop.permute.xlu0 %278 }
  0xbe   :  { %v1408_v15 = vpop.permute.xlu0 %298 }
  0xc2   :  { %v1412_v16 = vpop.permute.xlu0 %474 }
  0xc6   :  { %v1418_v17 = vpop.permute.xlu0 %300 }
  0xca   :  { %v1422_v18 = vpop.permute.xlu0 %320 }
  0xce   :  { %v1428_v19 = vpop.permute.xlu0 %496 }
  0xd2   :  { %v1434_v21 = vpop.permute.xlu0 %322 }
  0xd3   :  { %1790 = vst [vmem:[#allocation12_spill] sm:$0xff] %v1434_v21 }
  0xd6   :  { %v1442_v23 = vpop.permute.xlu0 %342 }
  0xd7   :  { %1791 = vst [vmem:[#allocation13_spill] sm:$0xff] %v1442_v23 }
  0xda   :  { %v1450_v26 = vpop.permute.xlu0 %518 }
  0xdb   :  { %1792 = vst [vmem:[#allocation14_spill] sm:$0xff] %v1450_v26 }
  0xde   :  { %v1454_v28 = vpop.permute.xlu0 %344 }
  0xdf   :  { %1793 = vst [vmem:[#allocation15_spill] sm:$0xff] %v1454_v28 }
  0xe2   :  { %v1458_v30 = vpop.permute.xlu0 %364 }
  0xe3   :  { %1794 = vst [vmem:[#allocation16_spill] sm:$0xff] %v1458_v30 }
  0xe6   :  { %v1462_v32 = vpop.permute.xlu0 %540 }
  0xe7   :  { %1795 = vst [vmem:[#allocation17_spill] sm:$0xff] %v1462_v32 }
  0xea   :  { %v1346_v6 = vpop.f32.mrf.mxu0  ;;  %v367_v34 = vpop.permute.xlu0 %366 }
  0xeb   :  { %394 = vrot.lane.b32.xlu0 %v1346_v6, %s1223_s16  ;;  %224 = vrot.lane.b32.xlu1 %v1346_v6, %s1225_s18 }
  0xec   :  { %1034 = vmatprep.subr.mxu1 %v1346_v6  ;;  %v1355_v8 = vpop.f32.mrf.mxu0 }
  0xed   :  { %1035 = vmatpush3.msra.mxu1 %v1346_v6 }
  0xee   :  { %1036 = vmatprep.subr.mxu1 %v1355_v8 }
  0xef   :  { %1037 = vmatpush3.msra.mxu1 %v1355_v8  ;;  %416 = vrot.lane.b32.xlu0 %v1346_v6, %s1210_s0 }
  0xf0   :  { %268 = vrot.lane.b32.xlu1 %v1346_v6, %s1212_s5  ;;  %1039 = vmatmul.mubr.msk.f32.vlgmr.msra.gmra.mxu1 %vm63_vm0, %v1277_v3 }
  0xf1   :  { %1093 = vmatprep.subr.msk.mxu1 %vm668_vm3, %v563_v54 }
  0xf2   :  { %1095 = vmatpush3.msk.msra.mxu1 %vm668_vm3, %v563_v54 }
  0xf3   :  { %460 = vrot.lane.b32.xlu0 %v1346_v6, %s1214_s7  ;;  %1094 = vmatprep.subr.mxu1 %v562_v55 }
  0xf4   :  { %438 = vrot.lane.b32.xlu1 %v1346_v6, %s1211_s2  ;;  %1096 = vmatpush3.msra.mxu1 %v562_v55 }
  0xf7   :  { %482 = vrot.lane.b32.xlu0 %v1346_v6, %s1215_s8 }
  0xf8   :  { %284 = vrot.lane.b32.xlu1 %v1346_v6, %s1213_s6 }
  0xfb   :  { %504 = vrot.lane.b32.xlu0 %v1346_v6, %s1216_s9 }
  0xfc   :  { %306 = vrot.lane.b32.xlu1 %v1346_v6, %s1218_s11 }
  0xff   :  { %526 = vrot.lane.b32.xlu0 %v1346_v6, %s1217_s10 }
 0x100   :  { %328 = vrot.lane.b32.xlu1 %v1346_v6, %s1220_s13 }
 0x103   :  { %222 = vrot.lane.b32.xlu0 %v1355_v8, %s1225_s18 }
 0x104   :  { %350 = vrot.lane.b32.xlu1 %v1346_v6, %s1221_s14 }
 0x107   :  { %414 = vrot.lane.b32.xlu0 %v1355_v8, %s1210_s0 }
 0x108   :  { %372 = vrot.lane.b32.xlu1 %v1346_v6, %s1222_s15 }
 0x10c   :  { %392 = vrot.lane.b32.xlu1 %v1355_v8, %s1223_s16 }
 0x110   :  { %266 = vrot.lane.b32.xlu1 %v1355_v8, %s1212_s5 }
 0x114   :  { %436 = vrot.lane.b32.xlu1 %v1355_v8, %s1211_s2 }
 0x118   :  { %282 = vrot.lane.b32.xlu1 %v1355_v8, %s1213_s6 }
 0x11c   :  { %458 = vrot.lane.b32.xlu1 %v1355_v8, %s1214_s7 }
 0x120   :  { %304 = vrot.lane.b32.xlu1 %v1355_v8, %s1218_s11 }
 0x124   :  { %480 = vrot.lane.b32.xlu1 %v1355_v8, %s1215_s8 }
 0x128   :  { %326 = vrot.lane.b32.xlu1 %v1355_v8, %s1220_s13 }
 0x12c   :  { %502 = vrot.lane.b32.xlu1 %v1355_v8, %s1216_s9 }
 0x130   :  { %348 = vrot.lane.b32.xlu1 %v1355_v8, %s1221_s14 }
 0x134   :  { %524 = vrot.lane.b32.xlu1 %v1355_v8, %s1217_s10 }
 0x138   :  { %370 = vrot.lane.b32.xlu1 %v1355_v8, %s1222_s15 }
 0x13c   :  { %546 = vrot.lane.b32.xlu1 %v1355_v8, %s1219_s12 }
 0x15d   :  { %v1464_v35 = vpop.permute.xlu0 %394  ;;  %v1466_v36 = vpop.permute.xlu1 %224 }
 0x161   :  { %v1468_v37 = vpop.permute.xlu0 %416 }
 0x162   :  { %v269_v38 = vpop.permute.xlu1 %268 }
 0x163   :  { %v273_v51 = vsel %vm236_vm1, %v1374_v10, %v269_v38 }
 0x165   :  { %v1470_v39 = vpop.permute.xlu0 %460 }
 0x166   :  { %v1472_v40 = vpop.permute.xlu1 %438 }
 0x169   :  { %v1474_v41 = vpop.permute.xlu0 %482 }
 0x16a   :  { %v1476_v42 = vpop.permute.xlu1 %284 }
 0x16d   :  { %v1478_v43 = vpop.permute.xlu0 %504 }
 0x16e   :  { %v1480_v44 = vpop.permute.xlu1 %306 }
 0x171   :  { %v527_v45 = vpop.permute.xlu0 %526 }
 0x172   :  { %v1483_v46 = vsel %vm236_vm1, %v521_v33, %v527_v45  ;;  %v1485_v47 = vpop.permute.xlu1 %328 }
 0x173   :  { %1796 = vst [vmem:[#allocation18_spill] sm:$0xff] %v1483_v46  ;;  %1797 = vst [vmem:[#allocation19_spill] sm:$0xff] %v1485_v47 }
 0x176   :  { %v1487_v48 = vpop.permute.xlu1 %350 }
 0x177   :  { %1798 = vst [vmem:[#allocation20_spill] sm:$0xff] %v1487_v48 }
 0x17a   :  { %v373_v49 = vpop.permute.xlu1 %372 }
 0x17b   :  { %v1490_v50 = vsel %vm236_vm1, %v367_v34, %v373_v49  ;;  %v223_v34 = vpop.permute.xlu0 %222 }
 0x17c   :  { %1799 = vst [vmem:[#allocation21_spill] sm:$0xff] %v1490_v50 }
 0x17e   :  { %v393_v57 = vpop.permute.xlu1 %392 }
 0x17f   :  { %v415_v45 = vpop.permute.xlu0 %414 }
 0x182   :  { %v267_v58 = vpop.permute.xlu1 %266 }
 0x186   :  { %v1538_v59 = vpop.permute.xlu1 %436 }
 0x18a   :  { %v1544_v60 = vpop.permute.xlu1 %282 }
 0x18e   :  { %v1552_v61 = vpop.permute.xlu1 %458 }
 0x192   :  { %v1554_v62 = vpop.permute.xlu1 %304 }
 0x196   :  { %v1556_v63 = vpop.permute.xlu1 %480 }
 0x19a   :  { %v1558_v2 = vpop.permute.xlu1 %326 }
 0x19e   :  { %v1560_v3 = vpop.permute.xlu1 %502 }
 0x1a2   :  { %v1562_v10 = vpop.permute.xlu1 %348 }
 0x1a3   :  { %1800 = vst [vmem:[#allocation22_spill] sm:$0xff] %v1562_v10  ;;  %v238_v10 = vsel %vm236_vm1, %v1270_v0, %v1466_v36 }
 0x1a6   :  { %v1564_v33 = vpop.permute.xlu1 %524 }
 0x1a7   :  { %1801 = vst [vmem:[#allocation23_spill] sm:$0xff] %v1564_v33 }
 0x1aa   :  { %v1566_v38 = vpop.permute.xlu1 %370 }
 0x1ab   :  { %1802 = vst [vmem:[#allocation24_spill] sm:$0xff] %v1566_v38 }
 0x1ae   :  { %v1568_v49 = vpop.permute.xlu1 %546 }
 0x1af   :  { %1803 = vst [vmem:[#allocation25_spill] sm:$0xff] %v1568_v49  ;;  %v237_v49 = vsel %vm236_vm1, %v1272_v1, %v223_v34  ;;  %v256_v1 = vsel %vm236_vm1, %v1344_v5, %v1355_v8  ;;  %v426_v8 = vsel %vm236_vm1, %v1438_v22, %v415_v45  ;;  %v448_v22 = vsel %vm236_vm1, %v1366_v9, %v1538_v59 }
 0x1b0   :  { %v1040_v52 = vpop.f32.mrf.mxu1  ;;  %v470_v9 = vsel %vm236_vm1, %v1398_v13, %v1552_v61  ;;  %v316_v13 = vsel %vm236_vm1, %v1408_v15, %v1554_v62  ;;  %v1807_v62 = vld [vmem:[#allocation12_spill] sm:$0xff] }
 0x1b1   :  { %400 = vrot.lane.b32.xlu1 %v1040_v52, %s1222_s15  ;;  %232 = vrot.lane.b32.xlu0 %v1040_v52, %s1208_s21  ;;  %v1497_v53 = vsel %vm239_vm2, %v273_v51, %v1040_v52 }
 0x1b2   :  { %v1509_v56 = vpop.f32.mrf.mxu1 }
 0x1b5   :  { %422 = vrot.lane.b32.xlu1 %v1040_v52, %s1223_s16  ;;  %252 = vrot.lane.b32.xlu0 %v1040_v52, %s1225_s18 }
 0x1b9   :  { %444 = vrot.lane.b32.xlu1 %v1040_v52, %s1210_s0  ;;  %290 = vrot.lane.b32.xlu0 %v1040_v52, %s1212_s5 }
 0x1bd   :  { %466 = vrot.lane.b32.xlu1 %v1040_v52, %s1211_s2  ;;  %312 = vrot.lane.b32.xlu0 %v1040_v52, %s1213_s6 }
 0x1c1   :  { %488 = vrot.lane.b32.xlu1 %v1040_v52, %s1214_s7  ;;  %334 = vrot.lane.b32.xlu0 %v1040_v52, %s1218_s11 }
 0x1c5   :  { %510 = vrot.lane.b32.xlu1 %v1040_v52, %s1215_s8  ;;  %356 = vrot.lane.b32.xlu0 %v1040_v52, %s1220_s13 }
 0x1c9   :  { %532 = vrot.lane.b32.xlu1 %v1040_v52, %s1216_s9  ;;  %230 = vrot.lane.b32.xlu0 %v1509_v56, %s1208_s21 }
 0x1cd   :  { %398 = vrot.lane.b32.xlu1 %v1509_v56, %s1222_s15  ;;  %250 = vrot.lane.b32.xlu0 %v1509_v56, %s1225_s18 }
 0x1d1   :  { %420 = vrot.lane.b32.xlu1 %v1509_v56, %s1223_s16  ;;  %548 = vrot.lane.b32.xlu0 %v1346_v6, %s1219_s12 }
 0x1d5   :  { %542 = vrot.lane.b32.xlu1 %v1270_v0, %s1224_s17  ;;  %442 = vrot.lane.b32.xlu0 %v1509_v56, %s1210_s0  ;;  %v405_v0 = vsel %vm236_vm1, %v1430_v20, %v1464_v35 }
 0x1d9   :  { %464 = vrot.lane.b32.xlu1 %v1509_v56, %s1211_s2  ;;  %288 = vrot.lane.b32.xlu0 %v1509_v56, %s1212_s5 }
 0x1dd   :  { %486 = vrot.lane.b32.xlu1 %v1509_v56, %s1214_s7  ;;  %310 = vrot.lane.b32.xlu0 %v1509_v56, %s1213_s6 }
 0x1e1   :  { %508 = vrot.lane.b32.xlu1 %v1509_v56, %s1215_s8  ;;  %332 = vrot.lane.b32.xlu0 %v1509_v56, %s1218_s11 }
 0x1e5   :  { %530 = vrot.lane.b32.xlu1 %v1509_v56, %s1216_s9  ;;  %354 = vrot.lane.b32.xlu0 %v1509_v56, %s1220_s13 }
 0x1e9   :  { %552 = vrot.lane.b32.xlu1 %v1509_v56, %s1217_s10  ;;  %376 = vrot.lane.b32.xlu0 %v1509_v56, %s1221_s14 }
 0x1ed   :  { %554 = vrot.lane.b32.xlu1 %v1040_v52, %s1217_s10  ;;  %378 = vrot.lane.b32.xlu0 %v1040_v52, %s1221_s14 }
 0x223   :  { %v401_v51 = vpop.permute.xlu1 %400  ;;  %v233_v52 = vpop.permute.xlu0 %232 }
 0x224   :  { %v241_v47 = vsel %vm239_vm2, %v238_v10, %v233_v52  ;;  %v1812_v52 = vld [vmem:[#allocation14_spill] sm:$0xff] }
 0x227   :  { %v423_v54 = vpop.permute.xlu1 %422  ;;  %v253_v55 = vpop.permute.xlu0 %252 }
 0x22b   :  { %v445_v50 = vpop.permute.xlu1 %444  ;;  %v291_v32 = vpop.permute.xlu0 %290 }
 0x22f   :  { %v467_v30 = vpop.permute.xlu1 %466  ;;  %v1570_v46 = vpop.permute.xlu0 %312 }
 0x233   :  { %v1572_v28 = vpop.permute.xlu1 %488  ;;  %v1574_v48 = vpop.permute.xlu0 %334 }
 0x237   :  { %v1576_v26 = vpop.permute.xlu1 %510  ;;  %v1578_v33 = vpop.permute.xlu0 %356 }
 0x238   :  { %1804 = vst [vmem:[#allocation26_spill] sm:$0xff] %v1576_v26  ;;  %1805 = vst [vmem:[#allocation27_spill] sm:$0xff] %v1578_v33  ;;  %v404_v33 = vsel %vm236_vm1, %v1342_v4, %v393_v57  ;;  %v272_v4 = vsel %vm236_vm1, %v1352_v7, %v267_v58 }
 0x23b   :  { %v1582_v38 = vpop.permute.xlu1 %532  ;;  %v231_v23 = vpop.permute.xlu0 %230 }
 0x23c   :  { %v240_v21 = vsel %vm239_vm2, %v237_v49, %v231_v23  ;;  %v257_v23 = vsel %vm236_vm1, %v1444_v24, %v1346_v6  ;;  %v274_v6 = vsel %vm239_vm2, %v272_v4, %v1509_v56  ;;  %v427_v24 = vsel %vm236_vm1, %v1448_v25, %v1468_v37 }
 0x23d   :  { %1045 = vmatprep.mubr.msk.f32.mxu0 %vm571_vm4, %v240_v21  ;;  %v259_v5 = vsel %vm239_vm2, %v257_v23, %v253_v55  ;;  %v429_v35 = vsel %vm239_vm2, %v427_v24, %v423_v54  ;;  %v449_v25 = vsel %vm236_vm1, %v1382_v11, %v1472_v40  ;;  %v471_v11 = vsel %vm236_vm1, %v1452_v27, %v1470_v39  ;;  %v1819_v24 = vld [vmem:[#allocation25_spill] sm:$0xff] }
 0x23e   :  { %1046 = vmatmul.mubr.msk.f32.vlgmr.msra.gmra.mxu0 %vm571_vm4, %v241_v47  ;;  %v407_v47 = vsel %vm239_vm2, %v405_v0, %v401_v51  ;;  %v451_v58 = vsel %vm239_vm2, %v449_v25, %v445_v50  ;;  %v295_v40 = vsel %vm236_vm1, %v1402_v14, %v1476_v42  ;;  %v492_v14 = vsel %vm236_vm1, %v1412_v16, %v1556_v63  ;;  %v1811_v51 = vld [vmem:[#allocation23_spill] sm:$0xff] }
 0x23f   :  { %v399_v26 = vpop.permute.xlu1 %398  ;;  %v251_v34 = vpop.permute.xlu0 %250  ;;  %v317_v39 = vsel %vm236_vm1, %v1418_v17, %v1480_v44  ;;  %v338_v17 = vsel %vm236_vm1, %v1422_v18, %v1558_v2  ;;  %v1808_v2 = vld [vmem:[#allocation26_spill] sm:$0xff]  ;;  %v536_v54 = vsel %vm236_vm1, %v1812_v52, %v1811_v51 }
 0x240   :  { %v406_v21 = vsel %vm239_vm2, %v404_v33, %v399_v26  ;;  %v258_v36 = vsel %vm239_vm2, %v256_v1, %v251_v34  ;;  %v319_v15 = vsel %vm239_vm2, %v317_v39, %v1570_v46  ;;  %v1806_v46 = vld [vmem:[#allocation19_spill] sm:$0xff]  ;;  %v1813_v1 = vld [vmem:[#allocation20_spill] sm:$0xff] }
 0x241   :  { %1048 = vmatprep.mubr.msk.f32.mxu0 %vm571_vm4, %v258_v36  ;;  %1069 = vmatprep.mubr.msk.f32.mxu1 %vm571_vm4, %v406_v21  ;;  %v339_v63 = vsel %vm236_vm1, %v1807_v62, %v1806_v46  ;;  %v1814_v34 = vld [vmem:[#allocation15_spill] sm:$0xff] }
 0x242   :  { %1049 = vmatmul.mubr.msk.f32.gmra.mxu0 %vm571_vm4, %v259_v5  ;;  %1070 = vmatmul.mubr.msk.f32.vlgmr.msra.gmra.mxu1 %vm571_vm4, %v407_v47  ;;  %v341_v18 = vsel %vm239_vm2, %v339_v63, %v1574_v48  ;;  %v361_v0 = vsel %vm236_vm1, %v1814_v34, %v1813_v1  ;;  %v1815_v36 = vld [vmem:[#allocation27_spill] sm:$0xff]  ;;  %v1816_v47 = vld [vmem:[#allocation18_spill] sm:$0xff] }
 0x243   :  { %v421_v20 = vpop.permute.xlu1 %420  ;;  %v1616_v7 = vpop.permute.xlu0 %548  ;;  %1051 = vmatprep.mubr.msk.f32.mxu0 %vm571_vm4, %v274_v6  ;;  %v363_v4 = vsel %vm239_vm2, %v361_v0, %v1815_v36  ;;  %v539_v5 = vsel %vm239_vm2, %v1816_v47, %v1582_v38  ;;  %v1817_v6 = vld [vmem:[#allocation24_spill] sm:$0xff] }
 0x244   :  { %v428_v26 = vsel %vm239_vm2, %v426_v8, %v421_v20  ;;  %v1818_v8 = vld [vmem:[#allocation16_spill] sm:$0xff] }
 0x245   :  { %1072 = vmatprep.mubr.msk.f32.mxu1 %vm571_vm4, %v428_v26  ;;  %v382_v20 = vsel %vm236_vm1, %v1818_v8, %v1817_v6  ;;  %v1820_v26 = vld [vmem:[#allocation17_spill] sm:$0xff] }
 0x246   :  { %1052 = vmatmul.mubr.msk.f32.gmra.mxu0 %vm571_vm4, %v1497_v53  ;;  %1073 = vmatmul.mubr.msk.f32.gmra.mxu1 %vm571_vm4, %v429_v35  ;;  %v294_v53 = vsel %vm236_vm1, %v1390_v12, %v1544_v60  ;;  %v297_v12 = vsel %vm239_vm2, %v295_v40, %v291_v32  ;;  %v473_v60 = vsel %vm239_vm2, %v471_v11, %v467_v30  ;;  %v1745_v11 = vld [vmem:[%s1788_s3] ss:$0 sm:$0xff]  ;;  %s1226_s3 = smov [#allocation8]  }
 0x247   :  { %v1631_v56 = vpop.permute.xlu1 %542  ;;  %v443_v57 = vpop.permute.xlu0 %442  ;;  %v493_v30 = vsel %vm236_vm1, %v1456_v29, %v1474_v41  ;;  %v514_v29 = vsel %vm236_vm1, %v1428_v19, %v1560_v3  ;;  %v558_v35 = vsel %vm236_vm1, %v1820_v26, %v1819_v24  ;;  %s934_s23 = sshll.u32 %s1226_s3, 4  ;;  %s935_s23 = int_to_ptr.vmem [resolvable:$true] %s934_s23 }
 0x248   :  { %v450_v37 = vsel %vm239_vm2, %v448_v22, %v443_v57  ;;  %v495_v16 = vsel %vm239_vm2, %v493_v30, %v1572_v28  ;;  %v515_v28 = vsel %vm236_vm1, %v1460_v31, %v1478_v43  ;;  %v1809_v31 = vld [vmem:[#allocation22_spill] sm:$0xff]  ;;  %v1810_v43 = vld [vmem:[#allocation13_spill] sm:$0xff]  ;;  %s1179_s24 = scalar_lea.vmem %s935_s23, 4096  ;;  %p1184_p2 = scmp.lt.s32.totalorder %s935_s23, %s935_s23 }
 0x249   :  { %1075 = vmatprep.mubr.msk.f32.mxu1 %vm571_vm4, %v450_v37  ;;  %v517_v19 = vsel %vm239_vm2, %v515_v28, %v1808_v2  ;;  %v360_v3 = vsel %vm236_vm1, %v1810_v43, %v1809_v31  ;;  %v559_v37 = vsel %vm236_vm1, %v1631_v56, %v1616_v7  ;;  %p1180_p1 = scmp.ne.s32.totalorder %s935_s23, %s1179_s24  ;;  %p1185_p3 = scmp.lt.s32.totalorder %s1179_s24, %s1179_s24 }
 0x24a   :  { %1076 = vmatmul.mubr.msk.f32.gmra.mxu1 %vm571_vm4, %v451_v58 }
 0x24b   :  { %v465_v59 = vpop.permute.xlu1 %464  ;;  %v289_v10 = vpop.permute.xlu0 %288  ;;  %p1186_p4 = por %p1185_p3, %p1184_p2 }
 0x24c   :  { %v472_v50 = vsel %vm239_vm2, %v470_v9, %v465_v59  ;;  %v296_v33 = vsel %vm239_vm2, %v294_v53, %v289_v10  ;;  %v1821_v59 = vld [vmem:[#allocation21_spill] sm:$0xff] }
 0x24d   :  { %1054 = vmatprep.mubr.msk.f32.mxu0 %vm571_vm4, %v296_v33  ;;  %1078 = vmatprep.mubr.msk.f32.mxu1 %vm571_vm4, %v472_v50  ;;  %p1187_p5 = pnand %p1186_p4, %p1180_p1 }
 0x24e   :  { %1055 = vmatmul.mubr.msk.f32.gmra.mxu0 %vm571_vm4, %v297_v12  ;;  %1079 = vmatmul.mubr.msk.f32.gmra.mxu1 %vm571_vm4, %v473_v60 }
 0x24f   :  { %v487_v27 = vpop.permute.xlu1 %486  ;;  %v311_v32 = vpop.permute.xlu0 %310 }
 0x250   :  { %v494_v42 = vsel %vm239_vm2, %v492_v14, %v487_v27  ;;  %v318_v61 = vsel %vm239_vm2, %v316_v13, %v311_v32 }
 0x251   :  { %1057 = vmatprep.mubr.msk.f32.mxu0 %vm571_vm4, %v318_v61  ;;  %1081 = vmatprep.mubr.msk.f32.mxu1 %vm571_vm4, %v494_v42 }
 0x252   :  { %1058 = vmatmul.mubr.msk.f32.gmra.mxu0 %vm571_vm4, %v319_v15  ;;  %1082 = vmatmul.mubr.msk.f32.gmra.mxu1 %vm571_vm4, %v495_v16 }
 0x253   :  { %v509_v41 = vpop.permute.xlu1 %508  ;;  %v333_v44 = vpop.permute.xlu0 %332 }
 0x254   :  { %v516_v45 = vsel %vm239_vm2, %v514_v29, %v509_v41  ;;  %v340_v49 = vsel %vm239_vm2, %v338_v17, %v333_v44 }
 0x255   :  { %1060 = vmatprep.mubr.msk.f32.mxu0 %vm571_vm4, %v340_v49  ;;  %1084 = vmatprep.mubr.msk.f32.mxu1 %vm571_vm4, %v516_v45 }
 0x256   :  { %1061 = vmatmul.mubr.msk.f32.gmra.mxu0 %vm571_vm4, %v341_v18  ;;  %1085 = vmatmul.mubr.msk.f32.gmra.mxu1 %vm571_vm4, %v517_v19 }
 0x257   :  { %v531_v48 = vpop.permute.xlu1 %530  ;;  %v355_v55 = vpop.permute.xlu0 %354 }
 0x258   :  { %v538_v23 = vsel %vm239_vm2, %v536_v54, %v531_v48  ;;  %v362_v21 = vsel %vm239_vm2, %v360_v3, %v355_v55 }
 0x259   :  { %1063 = vmatprep.mubr.msk.f32.mxu0 %vm571_vm4, %v362_v21  ;;  %1087 = vmatprep.mubr.msk.f32.mxu1 %vm571_vm4, %v538_v23 }
 0x25a   :  { %1064 = vmatmul.mubr.msk.f32.gmra.mxu0 %vm571_vm4, %v363_v4  ;;  %1088 = vmatmul.mubr.msk.f32.gmra.mxu1 %vm571_vm4, %v539_v5 }
 0x25b   :  { %v553_v22 = vpop.permute.xlu1 %552  ;;  %v377_v57 = vpop.permute.xlu0 %376 }
 0x25c   :  { %v560_v38 = vsel %vm239_vm2, %v558_v35, %v553_v22  ;;  %v384_v25 = vsel %vm239_vm2, %v382_v20, %v377_v57 }
 0x25d   :  { %1066 = vmatprep.mubr.msk.f32.mxu0 %vm571_vm4, %v384_v25  ;;  %1090 = vmatprep.mubr.msk.f32.mxu1 %vm571_vm4, %v560_v38 }
 0x25f   :  { %v555_v58 = vpop.permute.xlu1 %554  ;;  %v379_v53 = vpop.permute.xlu0 %378 }
 0x260   :  { %v561_v9 = vsel %vm239_vm2, %v559_v37, %v555_v58  ;;  %v385_v10 = vsel %vm239_vm2, %v1821_v59, %v379_v53 }
 0x261   :  { %1067 = vmatmul.mubr.msk.f32.gmra.mxu0 %vm571_vm4, %v385_v10  ;;  %1091 = vmatmul.mubr.msk.f32.gmra.mxu1 %vm571_vm4, %v561_v9 }
 0x2fe   :  { %v1047_v40 = vpop.f32.mrf.mxu0 }
 0x2ff   :  { %v744_v50 = vadd.f32 %v1047_v40, %v1745_v11 }
 0x300   :  { %v738_v7 = vpop.f32.mrf.mxu0 }
 0x301   :  { %898 = vst [vmem:[#allocation8 + $0x8] sm:$0xff] %v744_v50  ;;  %v739_v56 = vadd.f32 %v1745_v11, %v738_v7 }
 0x302   :  { %v1050_v33 = vpop.f32.mrf.mxu0  ;;  %v1071_v12 = vpop.f32.mrf.mxu1 }
 0x303   :  { %897 = vst [vmem:[#allocation8] sm:$0xff] %v739_v56  ;;  %v754_v60 = vadd.f32 %v1050_v33, %v1745_v11  ;;  %v824_v13 = vadd.f32 %v1071_v12, %v1745_v11 }
 0x304   :  { %v748_v14 = vpop.f32.mrf.mxu0  ;;  %v818_v27 = vpop.f32.mrf.mxu1 }
 0x305   :  { %900 = vst [vmem:[#allocation8 + $0x18] sm:$0xff] %v754_v60  ;;  %914 = vst [vmem:[#allocation8 + $0x88] sm:$0xff] %v824_v13  ;;  %v749_v32 = vadd.f32 %v1745_v11, %v748_v14  ;;  %v819_v30 = vadd.f32 %v1745_v11, %v818_v27 }
 0x306   :  { %v1053_v39 = vpop.f32.mrf.mxu0  ;;  %v1074_v42 = vpop.f32.mrf.mxu1 }
 0x307   :  { %899 = vst [vmem:[#allocation8 + $0x10] sm:$0xff] %v749_v32  ;;  %913 = vst [vmem:[#allocation8 + $0x80] sm:$0xff] %v819_v30  ;;  %v764_v61 = vadd.f32 %v1053_v39, %v1745_v11  ;;  %v834_v15 = vadd.f32 %v1074_v42, %v1745_v11 }
 0x308   :  { %v758_v16 = vpop.f32.mrf.mxu0  ;;  %v828_v17 = vpop.f32.mrf.mxu1 }
 0x309   :  { %902 = vst [vmem:[#allocation8 + $0x28] sm:$0xff] %v764_v61  ;;  %916 = vst [vmem:[#allocation8 + $0x98] sm:$0xff] %v834_v15  ;;  %v759_v29 = vadd.f32 %v1745_v11, %v758_v16  ;;  %v829_v41 = vadd.f32 %v1745_v11, %v828_v17 }
 0x30a   :  { %v1077_v44 = vpop.f32.mrf.mxu1 }
 0x30b   :  { %901 = vst [vmem:[#allocation8 + $0x20] sm:$0xff] %v759_v29  ;;  %915 = vst [vmem:[#allocation8 + $0x90] sm:$0xff] %v829_v41  ;;  %v844_v28 = vadd.f32 %v1077_v44, %v1745_v11 }
 0x30c   :  { %v838_v46 = vpop.f32.mrf.mxu1 }
 0x30d   :  { %918 = vst [vmem:[#allocation8 + $0xa8] sm:$0xff] %v844_v28  ;;  %v839_v62 = vadd.f32 %v1745_v11, %v838_v46 }
 0x30e   :  { %v1056_v63 = vpop.f32.mrf.mxu0  ;;  %v1080_v45 = vpop.f32.mrf.mxu1 }
 0x30f   :  { %917 = vst [vmem:[#allocation8 + $0xa0] sm:$0xff] %v839_v62  ;;  %v774_v49 = vadd.f32 %v1056_v63, %v1745_v11  ;;  %v854_v18 = vadd.f32 %v1080_v45, %v1745_v11 }
 0x310   :  { %v768_v2 = vpop.f32.mrf.mxu0  ;;  %v848_v19 = vpop.f32.mrf.mxu1 }
 0x311   :  { %904 = vst [vmem:[#allocation8 + $0x38] sm:$0xff] %v774_v49  ;;  %920 = vst [vmem:[#allocation8 + $0xb8] sm:$0xff] %v854_v18  ;;  %v769_v31 = vadd.f32 %v1745_v11, %v768_v2  ;;  %v849_v43 = vadd.f32 %v1745_v11, %v848_v19 }
 0x312   :  { %v1059_v3 = vpop.f32.mrf.mxu0  ;;  %v1083_v51 = vpop.f32.mrf.mxu1 }
 0x313   :  { %903 = vst [vmem:[#allocation8 + $0x30] sm:$0xff] %v769_v31  ;;  %919 = vst [vmem:[#allocation8 + $0xb0] sm:$0xff] %v849_v43  ;;  %v784_v52 = vadd.f32 %v1059_v3, %v1745_v11  ;;  %v864_v54 = vadd.f32 %v1083_v51, %v1745_v11 }
 0x314   :  { %v778_v48 = vpop.f32.mrf.mxu0  ;;  %v858_v55 = vpop.f32.mrf.mxu1 }
 0x315   :  { %906 = vst [vmem:[#allocation8 + $0x48] sm:$0xff] %v784_v52  ;;  %922 = vst [vmem:[#allocation8 + $0xc8] sm:$0xff] %v864_v54  ;;  %v779_v1 = vadd.f32 %v1745_v11, %v778_v48  ;;  %v859_v34 = vadd.f32 %v1745_v11, %v858_v55 }
 0x316   :  { %v1062_v0 = vpop.f32.mrf.mxu0  ;;  %v1086_v23 = vpop.f32.mrf.mxu1 }
 0x317   :  { %905 = vst [vmem:[#allocation8 + $0x40] sm:$0xff] %v779_v1  ;;  %921 = vst [vmem:[#allocation8 + $0xc0] sm:$0xff] %v859_v34  ;;  %v794_v21 = vadd.f32 %v1062_v0, %v1745_v11  ;;  %v874_v36 = vadd.f32 %v1086_v23, %v1745_v11 }
 0x318   :  { %v788_v4 = vpop.f32.mrf.mxu0  ;;  %v868_v47 = vpop.f32.mrf.mxu1 }
 0x319   :  { %908 = vst [vmem:[#allocation8 + $0x58] sm:$0xff] %v794_v21  ;;  %924 = vst [vmem:[#allocation8 + $0xd8] sm:$0xff] %v874_v36  ;;  %v789_v5 = vadd.f32 %v1745_v11, %v788_v4  ;;  %v869_v6 = vadd.f32 %v1745_v11, %v868_v47 }
 0x31a   :  { %v1065_v8 = vpop.f32.mrf.mxu0  ;;  %v1089_v20 = vpop.f32.mrf.mxu1 }
 0x31b   :  { %907 = vst [vmem:[#allocation8 + $0x50] sm:$0xff] %v789_v5  ;;  %923 = vst [vmem:[#allocation8 + $0xd0] sm:$0xff] %v869_v6  ;;  %v804_v24 = vadd.f32 %v1065_v8, %v1745_v11  ;;  %v884_v26 = vadd.f32 %v1089_v20, %v1745_v11 }
 0x31c   :  { %v798_v35 = vpop.f32.mrf.mxu0  ;;  %v878_v22 = vpop.f32.mrf.mxu1 }
 0x31d   :  { %910 = vst [vmem:[#allocation8 + $0x68] sm:$0xff] %v804_v24  ;;  %926 = vst [vmem:[#allocation8 + $0xe8] sm:$0xff] %v884_v26  ;;  %v799_v57 = vadd.f32 %v1745_v11, %v798_v35  ;;  %v879_v38 = vadd.f32 %v1745_v11, %v878_v22 }
 0x31f   :  { %909 = vst [vmem:[#allocation8 + $0x60] sm:$0xff] %v799_v57  ;;  %925 = vst [vmem:[#allocation8 + $0xe0] sm:$0xff] %v879_v38 }
 0x321   :  { %v1068_v25 = vpop.f32.mrf.mxu0  ;;  %v1092_v37 = vpop.f32.mrf.mxu1 }
 0x322   :  { %v814_v58 = vadd.f32 %v1068_v25, %v1745_v11  ;;  %v894_v53 = vadd.f32 %v1092_v37, %v1745_v11 }
 0x323   :  { %v808_v9 = vpop.f32.mrf.mxu0  ;;  %v888_v59 = vpop.f32.mrf.mxu1 }
 0x324   :  { %912 = vst [vmem:[#allocation8 + $0x78] sm:$0xff] %v814_v58  ;;  %928 = vst [vmem:[#allocation8 + $0xf8] sm:$0xff] %v894_v53  ;;  %v809_v10 = vadd.f32 %v1745_v11, %v808_v9  ;;  %v889_v40 = vadd.f32 %v1745_v11, %v888_v59 }
 0x326   :  { %911 = vst [vmem:[#allocation8 + $0x70] sm:$0xff] %v809_v10  ;;  %927 = vst [vmem:[#allocation8 + $0xf0] sm:$0xff] %v889_v40 }
 0x327   :  { %1190 = shalt.err (!%p1187_p5)
}
 0x328   :  { %940 = dma.vmem_to_hbm [thread:$0]  %s935_s23, 4096, %s1789_s4, [#allocation4], %s1207_s20, %s1207_s20, %s1208_s21  }
 0x329   :  { %1203 = dma.done.wait [#allocation4], 4096  }
 0x32a   :  { %1204 = vsyncadd [#allocation4], 4294963200 }
 0x32b   :  { %944 = vsyncpa [#allocation3], 1 }
 0x32c   :  { %945 = vsyncpa [#allocation6], 1 }
 0x32d   :  { %946 = vsyncpa [#allocation4], 1 }

</bundles_post_ra>
